<compile_context>
chip_gen: v6e
topology: v6e:2x2x1
jax: 0.10.0
libtpu: 0.0.40
codegen_flags: <defaults>
</compile_context>

<pallas_src>
import functools

import jax
import jax.numpy as jnp
from jax.experimental import pallas as pl
from jax.experimental.pallas import tpu as pltpu


def init_project_kernel(x_ref, w1_ref, b1_ref, w2_ref, b2_ref,
                        w3_ref, b3_ref, o_ref, *, chunk):
    # x_ref: (2, TN) f32; o_ref: (C_outp, TN) f32 (batch dim squeezed away).
    tn = x_ref.shape[-1]

    # Hoist the (tiny) parameter loads out of the chunk loop.
    w1 = w1_ref[...]          # (32, 2)      f32, BN-folded
    b1 = b1_ref[...]          # (32, 1)      f32
    w2 = w2_ref[...]          # (64, 32)     bf16, BN-folded
    b2 = b2_ref[...]          # (64, 1)      f32
    w3 = w3_ref[...]          # (C_outp, 64) bf16
    b3 = b3_ref[...]          # (C_outp, 1)  f32

    def body(i, carry):
        lo = pl.multiple_of(i * chunk, chunk)
        x = x_ref[:, pl.ds(lo, chunk)]                        # (2, chunk) f32

        # Conv1d(2,32,k=1)+BN+ReLU: K=2 contraction as two broadcast FMAs on
        # the VPU (MXU would waste >98% of its K dimension), in f32.
        h1 = w1[:, 0:1] * x[0:1, :] + w1[:, 1:2] * x[1:2, :] + b1
        h1 = jnp.maximum(h1, 0.0)                             # (32, chunk) f32

        # Conv1d(32,64,k=1)+BN+ReLU: bf16 MXU matmul, f32 accumulate.
        # Small weight matrix is the LHS so the 64-row weight (not the
        # chunk-wide data) is the streamed vmatmul operand.
        h2 = jnp.dot(w2, h1.astype(jnp.bfloat16),
                     preferred_element_type=jnp.float32) + b2
        h2 = jnp.maximum(h2, 0.0)                             # (64, chunk) f32

        # Conv1d(64, channels, k=1): bf16 MXU matmul, f32 accumulate.
        y = jnp.dot(w3, h2.astype(jnp.bfloat16),
                    preferred_element_type=jnp.float32) + b3
        o_ref[:, pl.ds(lo, chunk)] = y.astype(o_ref.dtype)
        return carry

    # fori_loop (not an unrolled Python loop) bounds live ranges at large tn.
    jax.lax.fori_loop(0, tn // chunk, body, 0, unroll=2)


def fold_params(params):
    """Fold conv bias + eval-mode BatchNorm into the conv weights."""
    (w1, b1, a1, c1, w2, b2, a2, c2, w3, b3) = params
    w1f = a1 * w1                 # (32, 2)
    b1f = a1 * b1 + c1            # (32, 1)
    w2f = a2 * w2                 # (64, 32)
    b2f = a2 * b2 + c2            # (64, 1)
    return (w1f, b1f, w2f, b2f, w3, b3)


def init_project_pallas(x, params, *, tn=8192, chunk=256):
    """x: (B, 2, N) float32 (NCW like PyTorch Conv1d). Returns (B, channels, N)."""
    B, Cin, N = x.shape
    assert Cin == 2
    w1f, b1f, w2f, b2f, w3, b3 = fold_params(params)
    channels = w3.shape[0]

    # Pad output channels to a multiple of 8 (full sublane groups in stores).
    c_pad = (-channels) % 8
    if c_pad:
        w3 = jnp.pad(w3, ((0, c_pad), (0, 0)))
        b3 = jnp.pad(b3, ((0, c_pad), (0, 0)))
    c_outp = channels + c_pad

    # MXU operands in bf16 (accumulation stays f32 inside the kernel).
    w2f_mxu = w2f.astype(jnp.bfloat16)
    w3_mxu = w3.astype(jnp.bfloat16)

    # Tile / chunk selection (lane dim must stay a multiple of 128).
    tn = min(tn, N)
    chunk = min(chunk, tn)
    assert N % tn == 0 and tn % chunk == 0 and chunk % 128 == 0, \
        "N must be a multiple of 128"
    # TODO(synk): ragged point counts would need a masked last tile; here we
    # require N to be pre-padded to a multiple of 128.

    # Keep >= 2 grid steps so the "parallel" axes can shard across v7x's 2 TCs.
    while (B * (N // tn) < 2 and tn > chunk
           and (tn // 2) % chunk == 0 and N % (tn // 2) == 0):
        tn //= 2

    grid = (B, N // tn)

    # VMEM budget: 2 pipeline buffers per I/O block (+ tiny weights). Only
    # raise the scoped limit if we actually need it (v5e default is 16 MiB).
    est_vmem = 2 * tn * 4 * (Cin + c_outp) + 64 * 1024
    cp_kwargs = dict(dimension_semantics=("parallel", "parallel"))
    if est_vmem > 12 * 1024 * 1024:
        cp_kwargs["vmem_limit_bytes"] = min(2 * est_vmem, 64 * 1024 * 1024)

    total = B * N
    cost = pl.CostEstimate(
        flops=2 * total * (32 * Cin + 64 * 32 + c_outp * 64),
        transcendentals=0,
        bytes_accessed=(Cin + c_outp) * total * 4,
    )

    kernel = functools.partial(init_project_kernel, chunk=chunk)
    wspec = lambda arr: pl.BlockSpec(arr.shape, lambda b, n: (0, 0))

    out = pl.pallas_call(
        kernel,
        out_shape=jax.ShapeDtypeStruct((B, c_outp, N), x.dtype),
        grid=grid,
        in_specs=[
            pl.BlockSpec((None, Cin, tn), lambda b, n: (b, 0, n)),
            wspec(w1f), wspec(b1f),
            wspec(w2f_mxu), wspec(b2f),
            wspec(w3_mxu), wspec(b3),
        ],
        out_specs=pl.BlockSpec((None, c_outp, tn), lambda b, n: (b, 0, n)),
        compiler_params=pltpu.CompilerParams(**cp_kwargs),
        cost_estimate=cost,
    )(x, w1f, b1f, w2f_mxu, b2f, w3_mxu, b3)

    return out[:, :channels, :] if c_pad else out


def make_params(channels, key):
    """Deterministic synthetic parameters mirroring the module's __init__ shapes."""
    ks = jax.random.split(key, 12)
    eps = 1e-5

    def conv(kw, kb, c_out, c_in):
        w = jax.random.normal(kw, (c_out, c_in), jnp.float32) * (1.0 / c_in ** 0.5)
        b = jax.random.normal(kb, (c_out, 1), jnp.float32) * 0.1
        return w, b

    def bn(kg, kb, km, kv, c):
        gamma = 1.0 + 0.1 * jax.random.normal(kg, (c, 1), jnp.float32)
        beta = 0.1 * jax.random.normal(kb, (c, 1), jnp.float32)
        mean = 0.1 * jax.random.normal(km, (c, 1), jnp.float32)
        var = jnp.abs(jax.random.normal(kv, (c, 1), jnp.float32)) + 0.5
        a = gamma / jnp.sqrt(var + eps)        # scale
        c_ = beta - a * mean                   # shift
        return a, c_

    w1, b1 = conv(ks[0], ks[1], 32, 2)
    a1, c1 = bn(ks[2], ks[3], ks[4], ks[5], 32)
    w2, b2 = conv(ks[6], ks[7], 64, 32)
    a2, c2 = bn(ks[8], ks[9], ks[10], ks[11], 64)
    w3, b3 = conv(jax.random.fold_in(key, 100), jax.random.fold_in(key, 101),
                  channels, 64)
    return (w1, b1, a1, c1, w2, b2, a2, c2, w3, b3)


def init_project_ref(x, params):
    """Pure-JAX f32 reference (unfolded math, NCW layout, eval-mode BN)."""
    (w1, b1, a1, c1, w2, b2, a2, c2, w3, b3) = params
    h = jnp.einsum("oc,bcn->bon", w1, x) + b1[None]
    h = jnp.maximum(a1[None] * h + c1[None], 0.0)
    h = jnp.einsum("oc,bcn->bon", w2, h) + b2[None]
    h = jnp.maximum(a2[None] * h + c2[None], 0.0)
    return jnp.einsum("oc,bcn->bon", w3, h) + b3[None]


if __name__ == "__main__":
    key = jax.random.PRNGKey(0)
    k_x, k_p = jax.random.split(key)

    # x: (B, 2, N) -- NCW like PyTorch Conv1d. channels=20 exercises the
    # pad-to-multiple-of-8 output path.
    B, N, channels = 2, 512, 20
    x = jax.random.normal(k_x, (B, 2, N), jnp.float32)
    params = make_params(channels, k_p)
    ref = init_project_ref(x, params)

    # Default tiling: tn clamps to N -> grid (2, 1), chunk=256 -> 2 chunk iters.
    out = jax.block_until_ready(init_project_pallas(x, params))
    assert out.shape == (B, channels, N)
    # bf16 MXU operands (f32 accumulate) -> looser tolerance vs f32 reference.
    assert jnp.allclose(out, ref, atol=5e-2, rtol=5e-2), "mismatch vs reference"

    # Smaller tile: exercises the N grid axis (grid (2, 2)) / multi-step pipeline.
    out2 = jax.block_until_ready(init_project_pallas(x, params, tn=256))
    assert jnp.allclose(out2, ref, atol=5e-2, rtol=5e-2), "mismatch vs reference (tn=256)"

    print("KERNEL_OK")
</pallas_src>

<mosaic_0001>
module attributes {stable_mosaic.version = 11 : i64} {
  func.func @init_project_kernel(%arg0: i32, %arg1: i32, %arg2: memref<1x2x512xf32, #tpu.memory_space<vmem>>, %arg3: memref<32x2xf32, #tpu.memory_space<vmem>>, %arg4: memref<32x1xf32, #tpu.memory_space<vmem>>, %arg5: memref<64x32xbf16, #tpu.memory_space<vmem>>, %arg6: memref<64x1xf32, #tpu.memory_space<vmem>>, %arg7: memref<24x64xbf16, #tpu.memory_space<vmem>>, %arg8: memref<24x1xf32, #tpu.memory_space<vmem>>, %arg9: memref<1x24x512xf32, #tpu.memory_space<vmem>>) attributes {dimension_semantics = [#tpu.dimension_semantics<parallel>, #tpu.dimension_semantics<parallel>], iteration_bounds = array<i64: 2, 1>, scalar_prefetch = 0 : i64, scratch_operands = 0 : i64, tpu.core_type = #tpu.core_type<tc>, window_params = [{transform_indices = @transform_0, window_bounds = array<i64: 1, 2, 512>}, {pipeline_mode = #tpu.pipeline_mode<synchronous>, transform_indices = @transform_1, window_bounds = array<i64: 32, 2>}, {pipeline_mode = #tpu.pipeline_mode<synchronous>, transform_indices = @transform_2, window_bounds = array<i64: 32, 1>}, {pipeline_mode = #tpu.pipeline_mode<synchronous>, transform_indices = @transform_3, window_bounds = array<i64: 64, 32>}, {pipeline_mode = #tpu.pipeline_mode<synchronous>, transform_indices = @transform_4, window_bounds = array<i64: 64, 1>}, {pipeline_mode = #tpu.pipeline_mode<synchronous>, transform_indices = @transform_5, window_bounds = array<i64: 24, 64>}, {pipeline_mode = #tpu.pipeline_mode<synchronous>, transform_indices = @transform_6, window_bounds = array<i64: 24, 1>}, {transform_indices = @transform_7, window_bounds = array<i64: 1, 24, 512>}]} {
    %c0 = arith.constant 0 : index
    %c0_0 = arith.constant 0 : index
    %0 = vector.load %arg3[%c0, %c0_0] : memref<32x2xf32, #tpu.memory_space<vmem>>, vector<32x2xf32>
    %c0_1 = arith.constant 0 : index
    %c0_2 = arith.constant 0 : index
    %1 = vector.load %arg4[%c0_1, %c0_2] : memref<32x1xf32, #tpu.memory_space<vmem>>, vector<32x1xf32>
    %c0_3 = arith.constant 0 : index
    %c0_4 = arith.constant 0 : index
    %2 = vector.load %arg5[%c0_3, %c0_4] : memref<64x32xbf16, #tpu.memory_space<vmem>>, vector<64x32xbf16>
    %c0_5 = arith.constant 0 : index
    %c0_6 = arith.constant 0 : index
    %3 = vector.load %arg6[%c0_5, %c0_6] : memref<64x1xf32, #tpu.memory_space<vmem>>, vector<64x1xf32>
    %c0_7 = arith.constant 0 : index
    %c0_8 = arith.constant 0 : index
    %4 = vector.load %arg7[%c0_7, %c0_8] : memref<24x64xbf16, #tpu.memory_space<vmem>>, vector<24x64xbf16>
    %c0_9 = arith.constant 0 : index
    %c0_10 = arith.constant 0 : index
    %5 = vector.load %arg8[%c0_9, %c0_10] : memref<24x1xf32, #tpu.memory_space<vmem>>, vector<24x1xf32>
    %c0_i32 = arith.constant 0 : i32
    %c256_i32 = arith.constant 256 : i32
    %6 = arith.muli %c0_i32, %c256_i32 : i32
    %7 = tpu.assume_multiple %6, 256 : i32
    %c0_11 = arith.constant 0 : index
    %c0_12 = arith.constant 0 : index
    %8 = arith.index_cast %7 : i32 to index
    %9 = vector.load %arg2[%c0_11, %c0_12, %8] : memref<1x2x512xf32, #tpu.memory_space<vmem>>, vector<1x2x256xf32>
    %10 = vector.shape_cast %9 : vector<1x2x256xf32> to vector<2x256xf32>
    %11 = vector.extract_strided_slice %0 {offsets = [0, 0], sizes = [32, 1], strides = [1, 1]} : vector<32x2xf32> to vector<32x1xf32>
    %12 = vector.extract_strided_slice %10 {offsets = [0, 0], sizes = [1, 256], strides = [1, 1]} : vector<2x256xf32> to vector<1x256xf32>
    %13 = vector.broadcast %11 : vector<32x1xf32> to vector<32x256xf32>
    %14 = vector.broadcast %12 : vector<1x256xf32> to vector<32x256xf32>
    %15 = arith.mulf %13, %14 : vector<32x256xf32>
    %16 = vector.extract_strided_slice %0 {offsets = [0, 1], sizes = [32, 1], strides = [1, 1]} : vector<32x2xf32> to vector<32x1xf32>
    %17 = vector.extract_strided_slice %10 {offsets = [1, 0], sizes = [1, 256], strides = [1, 1]} : vector<2x256xf32> to vector<1x256xf32>
    %18 = vector.broadcast %16 : vector<32x1xf32> to vector<32x256xf32>
    %19 = vector.broadcast %17 : vector<1x256xf32> to vector<32x256xf32>
    %20 = arith.mulf %18, %19 : vector<32x256xf32>
    %21 = arith.addf %15, %20 : vector<32x256xf32>
    %22 = vector.broadcast %1 : vector<32x1xf32> to vector<32x256xf32>
    %23 = arith.addf %21, %22 : vector<32x256xf32>
    %cst = arith.constant 0.000000e+00 : f32
    %24 = vector.broadcast %cst : f32 to vector<32x256xf32>
    %25 = arith.maximumf %23, %24 : vector<32x256xf32>
    %26 = arith.truncf %25 : vector<32x256xf32> to vector<32x256xbf16>
    %cst_13 = arith.constant dense<0.000000e+00> : vector<64x256xf32>
    %27 = tpu.matmul %2, %26, %cst_13 {dimension_numbers = #tpu.dot_dimension_numbers<[1], [0], [0], [1], [0, 0, 1, 1], [], []>} : vector<64x32xbf16>, vector<32x256xbf16>, vector<64x256xf32> -> vector<64x256xf32>
    %28 = vector.broadcast %3 : vector<64x1xf32> to vector<64x256xf32>
    %29 = arith.addf %27, %28 : vector<64x256xf32>
    %cst_14 = arith.constant 0.000000e+00 : f32
    %30 = vector.broadcast %cst_14 : f32 to vector<64x256xf32>
    %31 = arith.maximumf %29, %30 : vector<64x256xf32>
    %32 = arith.truncf %31 : vector<64x256xf32> to vector<64x256xbf16>
    %cst_15 = arith.constant dense<0.000000e+00> : vector<24x256xf32>
    %33 = tpu.matmul %4, %32, %cst_15 {dimension_numbers = #tpu.dot_dimension_numbers<[1], [0], [0], [1], [0, 0, 1, 1], [], []>} : vector<24x64xbf16>, vector<64x256xbf16>, vector<24x256xf32> -> vector<24x256xf32>
    %34 = vector.broadcast %5 : vector<24x1xf32> to vector<24x256xf32>
    %35 = arith.addf %33, %34 : vector<24x256xf32>
    %c0_16 = arith.constant 0 : index
    %c0_17 = arith.constant 0 : index
    %36 = arith.index_cast %7 : i32 to index
    %37 = vector.load %arg9[%c0_16, %c0_17, %36] : memref<1x24x512xf32, #tpu.memory_space<vmem>>, vector<1x24x256xf32>
    %38 = vector.shape_cast %37 : vector<1x24x256xf32> to vector<24x256xf32>
    %39 = vector.shape_cast %35 : vector<24x256xf32> to vector<1x24x256xf32>
    tpu.vector_store %arg9[%c0_16, %c0_17, %36], %39 {strides = array<i32>} : memref<1x24x512xf32, #tpu.memory_space<vmem>>, vector<1x24x256xf32>,
    %c1_i32 = arith.constant 1 : i32
    %c256_i32_18 = arith.constant 256 : i32
    %40 = arith.muli %c1_i32, %c256_i32_18 : i32
    %41 = tpu.assume_multiple %40, 256 : i32
    %c0_19 = arith.constant 0 : index
    %c0_20 = arith.constant 0 : index
    %42 = arith.index_cast %41 : i32 to index
    %43 = vector.load %arg2[%c0_19, %c0_20, %42] : memref<1x2x512xf32, #tpu.memory_space<vmem>>, vector<1x2x256xf32>
    %44 = vector.shape_cast %43 : vector<1x2x256xf32> to vector<2x256xf32>
    %45 = vector.extract_strided_slice %0 {offsets = [0, 0], sizes = [32, 1], strides = [1, 1]} : vector<32x2xf32> to vector<32x1xf32>
    %46 = vector.extract_strided_slice %44 {offsets = [0, 0], sizes = [1, 256], strides = [1, 1]} : vector<2x256xf32> to vector<1x256xf32>
    %47 = vector.broadcast %45 : vector<32x1xf32> to vector<32x256xf32>
    %48 = vector.broadcast %46 : vector<1x256xf32> to vector<32x256xf32>
    %49 = arith.mulf %47, %48 : vector<32x256xf32>
    %50 = vector.extract_strided_slice %0 {offsets = [0, 1], sizes = [32, 1], strides = [1, 1]} : vector<32x2xf32> to vector<32x1xf32>
    %51 = vector.extract_strided_slice %44 {offsets = [1, 0], sizes = [1, 256], strides = [1, 1]} : vector<2x256xf32> to vector<1x256xf32>
    %52 = vector.broadcast %50 : vector<32x1xf32> to vector<32x256xf32>
    %53 = vector.broadcast %51 : vector<1x256xf32> to vector<32x256xf32>
    %54 = arith.mulf %52, %53 : vector<32x256xf32>
    %55 = arith.addf %49, %54 : vector<32x256xf32>
    %56 = vector.broadcast %1 : vector<32x1xf32> to vector<32x256xf32>
    %57 = arith.addf %55, %56 : vector<32x256xf32>
    %cst_21 = arith.constant 0.000000e+00 : f32
    %58 = vector.broadcast %cst_21 : f32 to vector<32x256xf32>
    %59 = arith.maximumf %57, %58 : vector<32x256xf32>
    %60 = arith.truncf %59 : vector<32x256xf32> to vector<32x256xbf16>
    %cst_22 = arith.constant dense<0.000000e+00> : vector<64x256xf32>
    %61 = tpu.matmul %2, %60, %cst_22 {dimension_numbers = #tpu.dot_dimension_numbers<[1], [0], [0], [1], [0, 0, 1, 1], [], []>} : vector<64x32xbf16>, vector<32x256xbf16>, vector<64x256xf32> -> vector<64x256xf32>
    %62 = vector.broadcast %3 : vector<64x1xf32> to vector<64x256xf32>
    %63 = arith.addf %61, %62 : vector<64x256xf32>
    %cst_23 = arith.constant 0.000000e+00 : f32
    %64 = vector.broadcast %cst_23 : f32 to vector<64x256xf32>
    %65 = arith.maximumf %63, %64 : vector<64x256xf32>
    %66 = arith.truncf %65 : vector<64x256xf32> to vector<64x256xbf16>
    %cst_24 = arith.constant dense<0.000000e+00> : vector<24x256xf32>
    %67 = tpu.matmul %4, %66, %cst_24 {dimension_numbers = #tpu.dot_dimension_numbers<[1], [0], [0], [1], [0, 0, 1, 1], [], []>} : vector<24x64xbf16>, vector<64x256xbf16>, vector<24x256xf32> -> vector<24x256xf32>
    %68 = vector.broadcast %5 : vector<24x1xf32> to vector<24x256xf32>
    %69 = arith.addf %67, %68 : vector<24x256xf32>
    %c0_25 = arith.constant 0 : index
    %c0_26 = arith.constant 0 : index
    %70 = arith.index_cast %41 : i32 to index
    %71 = vector.load %arg9[%c0_25, %c0_26, %70] : memref<1x24x512xf32, #tpu.memory_space<vmem>>, vector<1x24x256xf32>
    %72 = vector.shape_cast %71 : vector<1x24x256xf32> to vector<24x256xf32>
    %73 = vector.shape_cast %69 : vector<24x256xf32> to vector<1x24x256xf32>
    tpu.vector_store %arg9[%c0_25, %c0_26, %70], %73 {strides = array<i32>} : memref<1x24x512xf32, #tpu.memory_space<vmem>>, vector<1x24x256xf32>,
    %c2_i32 = arith.constant 2 : i32
    return
  }
  func.func @transform_0(%arg0: i32, %arg1: i32) -> (i32, i32, i32) {
    %c0_i32 = arith.constant 0 : i32
    %c0_i32_0 = arith.constant 0 : i32
    return %arg0, %c0_i32, %arg1 : i32, i32, i32
  }
  func.func @transform_1(%arg0: i32, %arg1: i32) -> (i32, i32) {
    %c0_i32 = arith.constant 0 : i32
    %c0_i32_0 = arith.constant 0 : i32
    %c0_i32_1 = arith.constant 0 : i32
    return %c0_i32, %c0_i32_0 : i32, i32
  }
  func.func @transform_2(%arg0: i32, %arg1: i32) -> (i32, i32) {
    %c0_i32 = arith.constant 0 : i32
    %c0_i32_0 = arith.constant 0 : i32
    %c0_i32_1 = arith.constant 0 : i32
    return %c0_i32, %c0_i32_0 : i32, i32
  }
  func.func @transform_3(%arg0: i32, %arg1: i32) -> (i32, i32) {
    %c0_i32 = arith.constant 0 : i32
    %c0_i32_0 = arith.constant 0 : i32
    %c0_i32_1 = arith.constant 0 : i32
    return %c0_i32, %c0_i32_0 : i32, i32
  }
  func.func @transform_4(%arg0: i32, %arg1: i32) -> (i32, i32) {
    %c0_i32 = arith.constant 0 : i32
    %c0_i32_0 = arith.constant 0 : i32
    %c0_i32_1 = arith.constant 0 : i32
    return %c0_i32, %c0_i32_0 : i32, i32
  }
  func.func @transform_5(%arg0: i32, %arg1: i32) -> (i32, i32) {
    %c0_i32 = arith.constant 0 : i32
    %c0_i32_0 = arith.constant 0 : i32
    %c0_i32_1 = arith.constant 0 : i32
    return %c0_i32, %c0_i32_0 : i32, i32
  }
  func.func @transform_6(%arg0: i32, %arg1: i32) -> (i32, i32) {
    %c0_i32 = arith.constant 0 : i32
    %c0_i32_0 = arith.constant 0 : i32
    %c0_i32_1 = arith.constant 0 : i32
    return %c0_i32, %c0_i32_0 : i32, i32
  }
  func.func @transform_7(%arg0: i32, %arg1: i32) -> (i32, i32, i32) {
    %c0_i32 = arith.constant 0 : i32
    %c0_i32_0 = arith.constant 0 : i32
    return %arg0, %c0_i32, %arg1 : i32, i32, i32
  }
}

</mosaic_0001>

<bundles_post_ra>
// kernel: tpu_custom_call.1
= control target key start
LH: loop header
LB: loop body
LE: loop exit
PB: predicated region body
PF: predicated region fallthrough
CT: control target
= control target key end

     0   :  { %12 = vsyncpa [#allocation3], 0  ;;  %s1694_s0 = inlined_call_operand.vmem [shape: f32[2,2,512], index: 0, kind: input, shape index: {}]   ;;  %s1695_s1 = inlined_call_operand.vmem [shape: f32[32,2], index: 1, kind: input, shape index: {}]   ;;  %s1696_s2 = inlined_call_operand.vmem [shape: f32[32,1], index: 2, kind: input, shape index: {}]   ;;  %s1697_s3 = inlined_call_operand.vmem [shape: bf16[64,32], index: 3, kind: input, shape index: {}]   ;;  %s1698_s4 = inlined_call_operand.vmem [shape: f32[64,1], index: 4, kind: input, shape index: {}]   ;;  %s1699_s5 = inlined_call_operand.vmem [shape: bf16[24,64], index: 5, kind: input, shape index: {}]   ;;  %s1700_s6 = inlined_call_operand.vmem [shape: f32[24,1], index: 6, kind: input, shape index: {}]   ;;  %s1701_s7 = inlined_call_operand.hbm [shape: f32[2,24,512], index: 7, kind: output, shape index: {}]  }
   0x1   :  { %14 = vsyncpa [#allocation3 + $0x1], 0  ;;  %s1299_s24 = smov 0   ;;  %s1301_s25 = smov 0  }
   0x2   :  { %s1303_s26 = smov 0   ;;  %s1305_s27 = smov 0  }
   0x3   :  { %s1307_s28 = smov 0   ;;  %s1309_s29 = smov 0  }
   0x4 LB: > { %s1067_s30 = sadd.s32 4294967295, %s1252_s29   ;;  %s1068_s8 = sadd.s32 4294967294, %s1252_s29   ;;  %s1252_s29 = sphi %s1309_s29, %s20_s29   ;;  %s1248_s28 = sphi %s1307_s28, %s1708_s28   ;;  %s1244_s27 = sphi %s1305_s27, %s1707_s27   ;;  %s1240_s26 = sphi %s1303_s26, %s1706_s26   ;;  %s1236_s25 = sphi %s1301_s25, %s1705_s25   ;;  %s1232_s24 = sphi %s1299_s24, %s1704_s24  }
   0x5   : > { %s32_s9 = sadd.s32 1, %s1248_s28  ;;  %s195_s10 = sadd.s32 1, %s1240_s26 }
   0x6   : > { %p34_p0 = scmp.ge.s32.totalorder %s32_s9, 2  ;;  %p205_p1 = scmp.ne.s32.totalorder %s1240_s26, %s1236_s25 }
   0x7   : > { %p206_p2 = scmp.eq.s32.totalorder %s1067_s30, 1  ;;  %p211_p3 = scmp.ne.s32.totalorder %s1236_s25, %s1232_s24 }
   0x8   : > { %s1710_s9 = smov (%p34_p0, %s32_s9), 0  ;;  %p212_p5 = scmp.eq.s32.totalorder %s1068_s8, 1 }
   0x9   : > { %p1339_p4 = por %p206_p2, %p205_p1  ;;  %s190_s12 = ssub.s32 %s1248_s28, %s1710_s9 }
   0xa   : > { %p1071_p6 = scmp.ge.s32.totalorder %s1252_s29, 1  ;;  %p193_p7 = scmp.eq.s32.totalorder %s190_s12, 0 }
   0xb   : > { %p1346_p8 = por %p212_p5, %p211_p3  ;;  %p261_p9 = scmp.lt.s32.totalorder %s1252_s29, 3 }
   0xc   : > { %s1352_s14 = scalar_select %p193_p7, %s1240_s26, %s195_s10  }
   0xd   : > { %p262_p10 = pnand %p1071_p6, %p261_p9 }
   0xe   : > { %p298_p11 = scmp.lt.s32.totalorder (!%p262_p10), %s1244_s27, 1  ;;  %s294_s20 = sand.u32 (!%p262_p10), 1, %s1236_s25  }
   0xf   : > { %265 = sbr.rel (%p262_p10) target bundleno = 909 (0x38d), region = 48  ;;  %s1256_s16 = smov (!%p262_p10), [#allocation2]  }
  0x10   : > { %s1180_s17 = sshll.u32 (!%p262_p10), %s1256_s16, 4  ;;  %s1181_s17 = int_to_ptr.vmem [resolvable:$false] %s1180_s17 }
  0x11   : > { %s1182_s18 = scalar_lea.vmem (!%p262_p10), %s1181_s17, 3072 }
  0x14   : > { %v311_v0 = vld [vmem:[%s1695_s1 + $0x10] sm:$0xff]  ;;  %v309_v1 = vld [vmem:[%s1695_s1] sm:$0xff]  ;;  %v361_v2 = vlaneseq  ;;  %v1254_v3 = vmov 1   ;;  %s299_s19 = scalar_select %p298_p11, %s1244_s27, 1  ;;  %v312_v5 = vld [vmem:[%s1695_s1 + $0x18] sm:$0xff]  ;;  %v1255_v6 = vmov 0  }
  0x15   : > { %1166 = vset.pattern.permute.xlu0 %v1254_v3  ;;  %1164 = vset.pattern.permute.xlu1 %v1254_v3  ;;  %v310_v11 = vld [vmem:[%s1695_s1 + $0x8] sm:$0xff]  ;;  %v316_v21 = vld [vmem:[%s1696_s2 + $0x18] sm:$0xff]  ;;  %v315_v22 = vld [vmem:[%s1696_s2 + $0x10] sm:$0xff]  ;;  %vm537_vm0 = vcmask 261120   ;;  %vm670_vm1 = vcmask 523264  }
  0x16   : > { %396 = vperm.xlu1 %1164, %v311_v0   ;;  %388 = vperm.xlu0 %1166, %v309_v1   ;;  %v1361_v4 = vshrl.u32 %v361_v2, 7  ;;  %s1102_s22 = sshll.u32 %s299_s19, 3  ;;  %v331_v23 = vld [vmem:[%s1698_s4 + $0x30] sm:$0xff]  ;;  %v313_v24 = vld [vmem:[%s1696_s2] sm:$0xff]  ;;  %v314_v26 = vld [vmem:[%s1696_s2 + $0x8] sm:$0xff] }
  0x17   : > { %582 = vmatprep.mubr.bf16.mxu0 %v1255_v6  ;;  %709 = vmatprep.mubr.bf16.mxu1 %v1255_v6  ;;  %s1376_s8 = scalar_lea.vmem %s1694_s0, %s1102_s22  ;;  %v329_v25 = vld [vmem:[%s1698_s4 + $0x20] sm:$0xff]  ;;  %v327_v27 = vld [vmem:[%s1698_s4 + $0x10] sm:$0xff]  ;;  %v332_v28 = vld [vmem:[%s1698_s4 + $0x38] sm:$0xff]  ;;  %s1104_s22 = smul.u32 1536, %s1244_s27 }
  0x18   : > { %v1370_v7 = vsub.s32 1, %v1361_v4  ;;  %v409_v8 = vsub.s32 3, %v1361_v4  ;;  %v1379_v9 = vsub.s32 0, %v1361_v4  ;;  %v367_v10 = vsub.s32 2, %v1361_v4  ;;  %v1086_v12 = vld [vmem:[%s1376_s8 + $0x4] sm:$0xf] }
  0x19   : > { %v325_v29 = vld [vmem:[%s1698_s4] sm:$0xff]  ;;  %v330_v30 = vld [vmem:[%s1698_s4 + $0x28] sm:$0xff]  ;;  %v328_v32 = vld [vmem:[%s1698_s4 + $0x18] sm:$0xff]  ;;  %s1640_s12 = scalar_lea.hbm %s1701_s7, %s1104_s22  ;;  %s1649_s27 = scalar_lea.sflag [#allocation3], %s294_s20 }
  0x1a   : > { %400 = vperm.xlu1 %1164, %v312_v5   ;;  %1167 = vset.pattern.permute.xlu0 %v1255_v6  ;;  %v766_v13 = vrot.slane %v1086_v12, %v1370_v7  ;;  %v770_v14 = vrot.slane %v1086_v12, %v409_v8  ;;  %v740_v15 = vrot.slane %v1086_v12, %v1379_v9  ;;  %v336_v31 = vld [vmem:[%s1700_s6] sm:$0xff]  ;;  %v338_v33 = vld [vmem:[%s1700_s6 + $0x10] sm:$0xff]  ;;  %v326_v34 = vld [vmem:[%s1698_s4 + $0x8] sm:$0xff] }
  0x1b   : > { %352 = vperm.xlu0 %1167, %v311_v0   ;;  %v744_v16 = vrot.slane %v1086_v12, %v367_v10  ;;  %v337_v35 = vld [vmem:[%s1700_s6 + $0x8] sm:$0xff]  ;;  %v339_v38 = vld [vmem:[%s1376_s8] sm:$0xf]  ;;  %s1103_s8 = smul.u32 96, %s294_s20 }
  0x1c   : > { %v1394_v17 = vrot.slane %v766_v13, %v1370_v7  ;;  %v1397_v18 = vrot.slane %v770_v14, %v1370_v7  ;;  %v1401_v19 = vrot.slane %v740_v15, %v1379_v9  ;;  %v406_v43 = vrot.slane %v339_v38, %v1370_v7 }
  0x1d   : > { %v1404_v20 = vrot.slane %v744_v16, %v1379_v9  ;;  %v410_v44 = vrot.slane %v339_v38, %v409_v8  ;;  %v364_v49 = vrot.slane %v339_v38, %v1379_v9  ;;  %v368_v50 = vrot.slane %v339_v38, %v367_v10  ;;  %s1588_s21 = scalar_lea.vmem [#allocation2], %s1103_s8 }
  0x1e   : > { %1165 = vset.pattern.permute.xlu1 %v1255_v6  ;;  %v416_v53 = vrot.slane %v406_v43, %v1370_v7  ;;  %s988_s23 = sshll.u32 %s1588_s21, 4  ;;  %s1642_s23 = int_to_ptr.vmem [resolvable:$true] %s988_s23 }
  0x1f   : > { %347 = vperm.xlu1 %1165, %v310_v11   ;;  %357 = vperm.xlu0 %1167, %v312_v5   ;;  %v420_v54 = vrot.slane %v410_v44, %v1370_v7  ;;  %v374_v59 = vrot.slane %v364_v49, %v1379_v9  ;;  %v378_v60 = vrot.slane %v368_v50, %v1379_v9  ;;  %s1176_s15 = scalar_lea.vmem %s1642_s23, 1536  ;;  %p1183_p1 = scmp.lt.s32.totalorder %s1642_s23, %s1181_s17 }
  0x20   : > { %p1177_p12 = scmp.ne.s32.totalorder %s1642_s23, %s1176_s15  ;;  %p1184_p2 = scmp.lt.s32.totalorder %s1182_s18, %s1176_s15 }
  0x22   : > { %p1178_p13 = pnand %p1177_p12, %p1339_p4  ;;  %p1185_p3 = por %p1184_p2, %p1183_p1 }
  0x23   : > { %1168 = vset.pattern.permute.xlu1 %v1254_v3  ;;  %342 = vperm.xlu0 %1167, %v309_v1  }
  0x24   : > { %392 = vperm.xlu1 %1168, %v310_v11   ;;  %p1179_p0 = pneg %p1178_p13 }
  0x26   : > { %p1186_p5 = pnand %p1185_p3, %p1179_p0 }
  0x27   : > { %454 = vperm.xlu0 %1167, %v316_v21  }
  0x28   : > { %1169 = vset.pattern.permute.xlu1 %v1255_v6 }
  0x29   : > { %449 = vperm.xlu1 %1169, %v315_v22  }
  0x2b   : > { %509 = vperm.xlu0 %1167, %v331_v23  }
  0x2d   : > { %439 = vperm.xlu1 %1169, %v313_v24  }
  0x2f   : > { %499 = vperm.xlu0 %1167, %v329_v25  }
  0x31   : > { %444 = vperm.xlu1 %1169, %v314_v26  }
  0x33   : > { %489 = vperm.xlu0 %1167, %v327_v27  }
  0x35   : > { %514 = vperm.xlu1 %1169, %v332_v28  }
  0x37   : > { %479 = vperm.xlu0 %1167, %v325_v29  }
  0x39   : > { %504 = vperm.xlu1 %1169, %v330_v30  }
  0x3b   : > { %649 = vperm.xlu0 %1167, %v336_v31  }
  0x3d   : > { %494 = vperm.xlu1 %1169, %v328_v32  }
  0x3f   : > { %659 = vperm.xlu0 %1167, %v338_v33  }
  0x41   : > { %484 = vperm.xlu1 %1169, %v326_v34  }
  0x45   : > { %654 = vperm.xlu1 %1169, %v337_v35  }
  0x91   : > { %v397_v36 = vpop.permute.xlu1 %396  ;;  %v389_v37 = vpop.permute.xlu0 %388 }
  0x92   : > { %v785_v39 = vmul.f32 %v1394_v17, %v397_v36  ;;  %v786_v40 = vmul.f32 %v1397_v18, %v397_v36  ;;  %v781_v41 = vmul.f32 %v1394_v17, %v389_v37  ;;  %v782_v42 = vmul.f32 %v1397_v18, %v389_v37 }
  0x93   : > { %v425_v1 = vmul.f32 %v416_v53, %v397_v36  ;;  %v426_v2 = vmul.f32 %v420_v54, %v397_v36  ;;  %v421_v16 = vmul.f32 %v416_v53, %v389_v37  ;;  %v422_v21 = vmul.f32 %v420_v54, %v389_v37 }
  0x95   : > { %v401_v45 = vpop.permute.xlu1 %400 }
  0x96   : > { %v787_v46 = vmul.f32 %v1394_v17, %v401_v45  ;;  %v788_v47 = vmul.f32 %v1397_v18, %v401_v45  ;;  %v353_v48 = vpop.permute.xlu0 %352  ;;  %v427_v5 = vmul.f32 %v416_v53, %v401_v45  ;;  %v428_v7 = vmul.f32 %v420_v54, %v401_v45 }
  0x97   : > { %v759_v51 = vmul.f32 %v1401_v19, %v353_v48  ;;  %v760_v52 = vmul.f32 %v1404_v20, %v353_v48  ;;  %v383_v12 = vmul.f32 %v374_v59, %v353_v48  ;;  %v384_v13 = vmul.f32 %v378_v60, %v353_v48 }
  0x99   : > { %v793_v55 = vadd.f32 %v785_v39, %v759_v51  ;;  %v794_v56 = vadd.f32 %v786_v40, %v760_v52  ;;  %v434_v34 = vadd.f32 %v426_v2, %v384_v13 }
  0x9a   : > { %v348_v57 = vpop.permute.xlu1 %347  ;;  %v358_v58 = vpop.permute.xlu0 %357 }
  0x9b   : > { %v757_v61 = vmul.f32 %v1401_v19, %v348_v57  ;;  %v758_v62 = vmul.f32 %v1404_v20, %v348_v57  ;;  %v761_v63 = vmul.f32 %v1401_v19, %v358_v58  ;;  %v762_v0 = vmul.f32 %v1404_v20, %v358_v58 }
  0x9c   : > { %v385_v3 = vmul.f32 %v374_v59, %v358_v58  ;;  %v386_v4 = vmul.f32 %v378_v60, %v358_v58  ;;  %v381_v35 = vmul.f32 %v374_v59, %v348_v57  ;;  %v382_v36 = vmul.f32 %v378_v60, %v348_v57 }
  0x9d   : > { %v795_v10 = vadd.f32 %v787_v46, %v761_v63  ;;  %v796_v11 = vadd.f32 %v788_v47, %v762_v0 }
  0x9e   : > { %v343_v8 = vpop.permute.xlu0 %342  ;;  %v436_v26 = vadd.f32 %v428_v7, %v386_v4  ;;  %v435_v27 = vadd.f32 %v427_v5, %v385_v3 }
  0x9f   : > { %v755_v9 = vmul.f32 %v1401_v19, %v343_v8  ;;  %v756_v14 = vmul.f32 %v1404_v20, %v343_v8  ;;  %v393_v15 = vpop.permute.xlu1 %392  ;;  %v379_v28 = vmul.f32 %v374_v59, %v343_v8  ;;  %v380_v29 = vmul.f32 %v378_v60, %v343_v8 }
  0xa0   : > { %v783_v22 = vmul.f32 %v1394_v17, %v393_v15  ;;  %v784_v23 = vmul.f32 %v1397_v18, %v393_v15  ;;  %v433_v20 = vadd.f32 %v425_v1, %v383_v12  ;;  %v423_v39 = vmul.f32 %v416_v53, %v393_v15 }
  0xa1   : > { %v789_v24 = vadd.f32 %v781_v41, %v755_v9  ;;  %v790_v25 = vadd.f32 %v782_v42, %v756_v14  ;;  %v424_v42 = vmul.f32 %v420_v54, %v393_v15  ;;  %v429_v43 = vadd.f32 %v421_v16, %v379_v28 }
  0xa2   : > { %v455_v30 = vpop.permute.xlu0 %454  ;;  %v791_v31 = vadd.f32 %v783_v22, %v757_v61  ;;  %v792_v32 = vadd.f32 %v784_v23, %v758_v62  ;;  %v430_v44 = vadd.f32 %v422_v21, %v380_v29  ;;  %v431_v63 = vadd.f32 %v423_v39, %v381_v35  ;;  %v1490_v23 = vld [vmem:[%s1697_s3] sm:$0xff]  }
  0xa3   : > { %v803_v33 = vadd.f32 %v795_v10, %v455_v30  ;;  %v804_v19 = vadd.f32 %v796_v11, %v455_v30  ;;  %v464_v38 = vadd.f32 %v455_v30, %v436_v26  ;;  %v463_v17 = vadd.f32 %v455_v30, %v435_v27  ;;  %v1514_v26 = vld [vmem:[%s1697_s3 + $0x18] sm:$0xff]  }
  0xa4   : > { %v450_v37 = vpop.permute.xlu1 %449  ;;  %v432_v0 = vadd.f32 %v424_v42, %v382_v36 }
  0xa5   : > { %v801_v18 = vadd.f32 %v793_v55, %v450_v37  ;;  %v802_v40 = vadd.f32 %v794_v56, %v450_v37  ;;  %v462_v41 = vadd.f32 %v450_v37, %v434_v34  ;;  %v461_v45 = vadd.f32 %v450_v37, %v433_v20 }
  0xa6   : > { %v811_v46 = vmax.f32 %v803_v33, 0.0  ;;  %v472_v51 = vmax.f32 %v464_v38, 0.0  ;;  %v471_v58 = vmax.f32 %v463_v17, 0.0  ;;  %v812_v57 = vmax.f32 %v804_v19, 0.0  ;;  %v1521_v36 = vpop.permute.xlu0 %509 }
  0xa7   : > { %v809_v47 = vmax.f32 %v801_v18, 0.0  ;;  %v470_v48 = vmax.f32 %v462_v41, 0.0  ;;  %v810_v49 = vmax.f32 %v802_v40, 0.0  ;;  %v469_v52 = vmax.f32 %v461_v45, 0.0 }
  0xa8   : > { %v440_v50 = vpop.permute.xlu1 %439 }
  0xa9   : > { %v457_v59 = vadd.f32 %v440_v50, %v429_v43  ;;  %v458_v60 = vadd.f32 %v440_v50, %v430_v44  ;;  %v797_v61 = vadd.f32 %v789_v24, %v440_v50  ;;  %v798_v53 = vadd.f32 %v790_v25, %v440_v50  ;;  %v1498_v24 = vld [vmem:[%s1697_s3 + $0x8] sm:$0xff]   ;;  %v1506_v25 = vld [vmem:[%s1697_s3 + $0x10] sm:$0xff]  }
  0xaa   : > { %v476_v55 = vpack.c.bf16 %v472_v51, %v470_v48  ;;  %v475_v56 = vpack.c.bf16 %v471_v58, %v469_v52  ;;  %v1479_v62 = vpack.c.bf16 %v812_v57, %v810_v49  ;;  %v1481_v54 = vpack.c.bf16 %v811_v46, %v809_v47  ;;  %v1525_v18 = vpop.permute.xlu0 %499 }
  0xab   : > { %v805_v7 = vmax.f32 %v797_v61, 0.0  ;;  %v466_v8 = vmax.f32 %v458_v60, 0.0  ;;  %v465_v10 = vmax.f32 %v457_v59, 0.0  ;;  %v806_v11 = vmax.f32 %v798_v53, 0.0 }
  0xac   : > { %562 = vmatprep.subr.bf16.mxu0 %v476_v55  ;;  %v445_v1 = vpop.permute.xlu1 %444 }
  0xad   : > { %v459_v2 = vadd.f32 %v445_v1, %v431_v63  ;;  %v460_v3 = vadd.f32 %v445_v1, %v432_v0  ;;  %v799_v4 = vadd.f32 %v791_v31, %v445_v1  ;;  %v800_v5 = vadd.f32 %v792_v32, %v445_v1  ;;  %563 = vmatpush1.bf16.msra.mxu0 %v475_v56 }
  0xae   : > { %v1535_v50 = vpop.permute.xlu0 %489 }
  0xaf   : > { %v807_v12 = vmax.f32 %v799_v4, 0.0  ;;  %v468_v13 = vmax.f32 %v460_v3, 0.0  ;;  %v467_v9 = vmax.f32 %v459_v2, 0.0  ;;  %v808_v14 = vmax.f32 %v800_v5, 0.0 }
  0xb0   : > { %v1519_v20 = vpop.permute.xlu1 %514 }
  0xb1   : > { %v474_v15 = vpack.c.bf16 %v468_v13, %v466_v8  ;;  %v473_v16 = vpack.c.bf16 %v467_v9, %v465_v10  ;;  %v1483_v21 = vpack.c.bf16 %v808_v14, %v806_v11  ;;  %v1485_v22 = vpack.c.bf16 %v807_v12, %v805_v7 }
  0xb2   : > { %v1545_v8 = vpop.permute.xlu0 %479 }
  0xb3   : > { %564 = vmatprep.subr.bf16.mxu0 %v474_v15 }
  0xb4   : > { %565 = vmatpush1.bf16.msra.mxu0 %v473_v16  ;;  %v1523_v17 = vpop.permute.xlu1 %504 }
  0xb7   : > { %1078 = vmatmul.mubr.msk.bf16.vlgmr.msra.gmra.mxu0 %vm537_vm0, %v1490_v23 }
  0xb8   : > { %592 = vmatprep.mubr.bf16.mxu0 %v1255_v6  ;;  %v1530_v45 = vpop.permute.xlu1 %494 }
  0xbc   : > { %v1541_v0 = vpop.permute.xlu1 %484 }
  0xbf   : > { %1079 = vmatmul.mubr.msk.bf16.gmra.mxu0 %vm537_vm0, %v1498_v24 }
  0xc0   : > { %602 = vmatprep.mubr.bf16.mxu0 %v1255_v6 }
  0xc7   : > { %1080 = vmatmul.mubr.msk.bf16.gmra.mxu0 %vm537_vm0, %v1506_v25 }
  0xc8   : > { %612 = vmatprep.mubr.bf16.mxu0 %v1255_v6 }
  0xcf   : > { %1081 = vmatmul.mubr.msk.bf16.gmra.mxu0 %vm537_vm0, %v1514_v26 }
  0xd0   : > { %946 = vmatprep.mubr.bf16.mxu0 %v1255_v6 }
 0x177   : > { %v584_v27 = vpop.f32.mrf.mxu0 }
 0x179   : > { %v586_v28 = vpop.f32.mrf.mxu0 }
 0x17a   : > { %v587_v12 = vadd.f32 %v586_v28, %v1545_v8 }
 0x17b   : > { %v588_v29 = vpop.f32.mrf.mxu0 }
 0x17c   : > { %v589_v9 = vadd.f32 %v588_v29, %v1541_v0  ;;  %v1554_v29 = vld [vmem:[%s1699_s5] sm:$0xff]  }
 0x17d   : > { %v590_v30 = vpop.f32.mrf.mxu0 }
 0x17e   : > { %v591_v4 = vadd.f32 %v590_v30, %v1541_v0  ;;  %v585_v30 = vadd.f32 %v584_v27, %v1545_v8  ;;  %v1565_v27 = vld [vmem:[%s1699_s5 + $0x8] ss:$0 sps:$4 sm:$0xff]  }
 0x17f   : > { %v594_v31 = vpop.f32.mrf.mxu0 }
 0x180   : > { %v595_v10 = vadd.f32 %v594_v31, %v1535_v50  ;;  %v626_v16 = vmax.f32 %v591_v4, 0.0 }
 0x181   : > { %v596_v32 = vpop.f32.mrf.mxu0 }
 0x182   : > { %v597_v55 = vadd.f32 %v596_v32, %v1535_v50 }
 0x183   : > { %v598_v33 = vpop.f32.mrf.mxu0 }
 0x184   : > { %v599_v1 = vadd.f32 %v598_v33, %v1530_v45  ;;  %v628_v13 = vmax.f32 %v597_v55, 0.0  ;;  %v627_v33 = vmax.f32 %v595_v10, 0.0 }
 0x185   : > { %v600_v19 = vpop.f32.mrf.mxu0 }
 0x186   : > { %v601_v58 = vadd.f32 %v600_v19, %v1530_v45  ;;  %v629_v14 = vmax.f32 %v599_v1, 0.0  ;;  %v624_v19 = vmax.f32 %v587_v12, 0.0 }
 0x187   : > { %v604_v34 = vpop.f32.mrf.mxu0 }
 0x188   : > { %v605_v61 = vadd.f32 %v604_v34, %v1525_v18  ;;  %v630_v5 = vmax.f32 %v601_v58, 0.0  ;;  %v625_v34 = vmax.f32 %v589_v9, 0.0  ;;  %v641_v31 = vpack.c.bf16 %v629_v14, %v627_v33 }
 0x189   : > { %v606_v35 = vpop.f32.mrf.mxu0 }
 0x18a   : > { %v607_v48 = vadd.f32 %v606_v35, %v1525_v18  ;;  %v631_v11 = vmax.f32 %v605_v61, 0.0  ;;  %v642_v32 = vpack.c.bf16 %v630_v5, %v628_v13  ;;  %v640_v35 = vpack.c.bf16 %v626_v16, %v624_v19 }
 0x18b   : > { %v608_v37 = vpop.f32.mrf.mxu0 }
 0x18c   : > { %v609_v51 = vadd.f32 %v608_v37, %v1523_v17  ;;  %v632_v56 = vmax.f32 %v607_v48, 0.0  ;;  %v623_v37 = vmax.f32 %v585_v30, 0.0 }
 0x18d   : > { %v610_v38 = vpop.f32.mrf.mxu0 }
 0x18e   : > { %v611_v42 = vadd.f32 %v610_v38, %v1523_v17  ;;  %v633_v2 = vmax.f32 %v609_v51, 0.0  ;;  %v639_v28 = vpack.c.bf16 %v625_v34, %v623_v37 }
 0x18f   : > { %v614_v39 = vpop.f32.mrf.mxu0 }
 0x190   : > { %v615_v46 = vadd.f32 %v614_v39, %v1521_v36  ;;  %v634_v57 = vmax.f32 %v611_v42, 0.0  ;;  %v643_v15 = vpack.c.bf16 %v633_v2, %v631_v11 }
 0x191   : > { %v616_v40 = vpop.f32.mrf.mxu0 }
 0x192   : > { %v617_v43 = vadd.f32 %v616_v40, %v1521_v36  ;;  %v635_v53 = vmax.f32 %v615_v46, 0.0  ;;  %v644_v7 = vpack.c.bf16 %v634_v57, %v632_v56 }
 0x193   : > { %v618_v41 = vpop.f32.mrf.mxu0 }
 0x194   : > { %v619_v44 = vadd.f32 %v618_v41, %v1519_v20  ;;  %v636_v59 = vmax.f32 %v617_v43, 0.0 }
 0x195   : > { %v620_v47 = vpop.f32.mrf.mxu0 }
 0x196   : > { %v621_v49 = vadd.f32 %v620_v47, %v1519_v20  ;;  %v637_v52 = vmax.f32 %v619_v44, 0.0 }
 0x198   : > { %v638_v60 = vmax.f32 %v621_v49, 0.0  ;;  %v645_v3 = vpack.c.bf16 %v637_v52, %v635_v53 }
 0x19a   : > { %v646_v63 = vpack.c.bf16 %v638_v60, %v636_v59 }
 0x19c   : > { %685 = vmatprep.subr.bf16.mxu1 %v646_v63 }
 0x19d   : > { %686 = vmatpush1.bf16.msra.mxu1 %v645_v3 }
 0x19e   : > { %687 = vmatprep.subr.bf16.mxu1 %v644_v7 }
 0x1a1   : > { %688 = vmatpush1.bf16.msra.mxu1 %v643_v15 }
 0x1a2   : > { %689 = vmatprep.subr.bf16.mxu1 %v642_v32 }
 0x1a5   : > { %690 = vmatpush1.bf16.msra.mxu1 %v641_v31 }
 0x1a6   : > { %691 = vmatprep.subr.bf16.mxu1 %v640_v35 }
 0x1a9   : > { %692 = vmatpush1.bf16.msra.mxu1 %v639_v28 }
 0x1aa   : > { %829 = vmatprep.subr.bf16.mxu1 %v1479_v62  ;;  %v1585_v62 = vpop.permute.xlu0 %649 }
 0x1ac   : > { %1084 = vmatmul.mubr.msk.bf16.vlgmr.msra.gmra.mxu1 %vm670_vm1, %v1554_v29 }
 0x1ad   : > { %830 = vmatpush1.bf16.msra.mxu1 %v1481_v54  ;;  %719 = vmatprep.mubr.bf16.mxu1 %v1255_v6 }
 0x1ae   : > { %831 = vmatprep.subr.bf16.mxu1 %v1483_v21  ;;  %v1598_v40 = vpop.permute.xlu0 %659 }
 0x1b1   : > { %832 = vmatpush1.bf16.msra.mxu1 %v1485_v22 }
 0x1b4   : > { %1085 = vmatmul.mubr.msk.bf16.gmra.mxu1 %vm670_vm1, %v1565_v27 }
 0x1b5   : > { %849 = vmatprep.mubr.bf16.mxu1 %v1255_v6 }
 0x1bc   : > { %1087 = vmatmul.mubr.msk.bf16.vlgmr.msra.gmra.mxu1 %vm537_vm0, %v1490_v23 }
 0x1bd   : > { %859 = vmatprep.mubr.bf16.mxu1 %v1255_v6 }
 0x1c4   : > { %1088 = vmatmul.mubr.msk.bf16.gmra.mxu1 %vm537_vm0, %v1498_v24  ;;  %v1592_v24 = vpop.permute.xlu1 %654 }
 0x1c5   : > { %869 = vmatprep.mubr.bf16.mxu1 %v1255_v6 }
 0x1cc   : > { %1089 = vmatmul.mubr.msk.bf16.gmra.mxu1 %vm537_vm0, %v1506_v25 }
 0x1cd   : > { %879 = vmatprep.mubr.bf16.mxu1 %v1255_v6 }
 0x1d4   : > { %1090 = vmatmul.mubr.msk.bf16.gmra.mxu1 %vm537_vm0, %v1514_v26 }
 0x26c   : > { %v711_v54 = vpop.f32.mrf.mxu1 }
 0x26d   : > { %v712_v21 = vadd.f32 %v711_v54, %v1585_v62 }
 0x26e   : > { %v713_v22 = vpop.f32.mrf.mxu1 }
 0x26f   : > { %728 = vst [vmem:[%s1588_s21] sm:$0xff] %v712_v21  ;;  %v714_v23 = vadd.f32 %v713_v22, %v1585_v62 }
 0x270   : > { %v715_v25 = vpop.f32.mrf.mxu1 }
 0x271   : > { %729 = vst [vmem:[%s1588_s21 + $0x8] sm:$0xff] %v714_v23  ;;  %v716_v26 = vadd.f32 %v715_v25, %v1592_v24 }
 0x272   : > { %v717_v38 = vpop.f32.mrf.mxu1 }
 0x273   : > { %730 = vst [vmem:[%s1588_s21 + $0x20] sm:$0xff] %v716_v26  ;;  %v718_v39 = vadd.f32 %v717_v38, %v1592_v24 }
 0x274   : > { %v721_v41 = vpop.f32.mrf.mxu1 }
 0x275   : > { %731 = vst [vmem:[%s1588_s21 + $0x28] sm:$0xff] %v718_v39  ;;  %v722_v42 = vadd.f32 %v721_v41, %v1598_v40 }
 0x276   : > { %v723_v43 = vpop.f32.mrf.mxu1 }
 0x277   : > { %732 = vst [vmem:[%s1588_s21 + $0x40] sm:$0xff] %v722_v42  ;;  %v724_v44 = vadd.f32 %v723_v43, %v1598_v40 }
 0x278   : > { %v725_v46 = vpop.f32.mrf.mxu1 }
 0x279   : > { %733 = vst [vmem:[%s1588_s21 + $0x48] sm:$0xff] %v724_v44 }
 0x27a   : > { %v726_v47 = vpop.f32.mrf.mxu1 }
 0x27c   : > { %v851_v48 = vpop.f32.mrf.mxu1 }
 0x27d   : > { %v852_v39 = vadd.f32 %v851_v48, %v1545_v8 }
 0x27e   : > { %v853_v49 = vpop.f32.mrf.mxu1 }
 0x27f   : > { %v890_v46 = vmax.f32 %v852_v39, 0.0 }
 0x280   : > { %v855_v51 = vpop.f32.mrf.mxu1 }
 0x281   : > { %v856_v23 = vadd.f32 %v855_v51, %v1541_v0 }
 0x282   : > { %v857_v52 = vpop.f32.mrf.mxu1 }
 0x284   : > { %v861_v58 = vpop.f32.mrf.mxu1 }
 0x285   : > { %v862_v54 = vadd.f32 %v861_v58, %v1535_v50 }
 0x286   : > { %v863_v57 = vpop.f32.mrf.mxu1 }
 0x287   : > { %v864_v19 = vadd.f32 %v863_v57, %v1535_v50  ;;  %v894_v41 = vmax.f32 %v862_v54, 0.0  ;;  %v892_v50 = vmax.f32 %v856_v23, 0.0 }
 0x288   : > { %v865_v59 = vpop.f32.mrf.mxu1 }
 0x289   : > { %v866_v31 = vadd.f32 %v865_v59, %v1530_v45  ;;  %v895_v22 = vmax.f32 %v864_v19, 0.0 }
 0x28a   : > { %v867_v60 = vpop.f32.mrf.mxu1 }
 0x28b   : > { %v868_v14 = vadd.f32 %v867_v60, %v1530_v45  ;;  %v896_v25 = vmax.f32 %v866_v31, 0.0 }
 0x28c   : > { %v871_v61 = vpop.f32.mrf.mxu1 }
 0x28d   : > { %v872_v30 = vadd.f32 %v871_v61, %v1525_v18  ;;  %v908_v43 = vpack.c.bf16 %v896_v25, %v894_v41 }
 0x28e   : > { %v873_v53 = vpop.f32.mrf.mxu1 }
 0x28f   : > { %v874_v11 = vadd.f32 %v873_v53, %v1525_v18  ;;  %v898_v21 = vmax.f32 %v872_v30, 0.0  ;;  %v854_v18 = vadd.f32 %v853_v49, %v1545_v8 }
 0x290   : > { %v875_v55 = vpop.f32.mrf.mxu1 }
 0x291   : > { %v876_v13 = vadd.f32 %v875_v55, %v1523_v17  ;;  %v899_v34 = vmax.f32 %v874_v11, 0.0  ;;  %v891_v42 = vmax.f32 %v854_v18, 0.0 }
 0x292   : > { %v877_v56 = vpop.f32.mrf.mxu1 }
 0x293   : > { %v878_v3 = vadd.f32 %v877_v56, %v1523_v17  ;;  %v900_v35 = vmax.f32 %v876_v13, 0.0  ;;  %v897_v17 = vmax.f32 %v868_v14, 0.0 }
 0x294   : > { %v881_v63 = vpop.f32.mrf.mxu1 }
 0x295   : > { %v882_v7 = vadd.f32 %v881_v63, %v1521_v36  ;;  %v901_v15 = vmax.f32 %v878_v3, 0.0  ;;  %v910_v26 = vpack.c.bf16 %v900_v35, %v898_v21  ;;  %v909_v38 = vpack.c.bf16 %v897_v17, %v895_v22 }
 0x296   : > { %v883_v1 = vpop.f32.mrf.mxu1 }
 0x297   : > { %v884_v4 = vadd.f32 %v883_v1, %v1521_v36  ;;  %v902_v33 = vmax.f32 %v882_v7, 0.0  ;;  %v911_v28 = vpack.c.bf16 %v901_v15, %v899_v34 }
 0x298   : > { %v885_v2 = vpop.f32.mrf.mxu1 }
 0x299   : > { %v886_v5 = vadd.f32 %v885_v2, %v1519_v20  ;;  %v903_v16 = vmax.f32 %v884_v4, 0.0 }
 0x29a   : > { %v887_v10 = vpop.f32.mrf.mxu1 }
 0x29b   : > { %v888_v12 = vadd.f32 %v887_v10, %v1519_v20  ;;  %v904_v9 = vmax.f32 %v886_v5, 0.0  ;;  %v858_v20 = vadd.f32 %v857_v52, %v1541_v0  ;;  %v906_v0 = vpack.c.bf16 %v892_v50, %v890_v46 }
 0x29d   : > { %v905_v32 = vmax.f32 %v888_v12, 0.0  ;;  %v912_v37 = vpack.c.bf16 %v904_v9, %v902_v33  ;;  %v893_v45 = vmax.f32 %v858_v20, 0.0 }
 0x29f   : > { %v913_v36 = vpack.c.bf16 %v905_v32, %v903_v16  ;;  %v907_v44 = vpack.c.bf16 %v893_v45, %v891_v42 }
 0x2a1   : > { %922 = vmatprep.subr.bf16.mxu0 %v913_v36 }
 0x2a2   : > { %923 = vmatpush1.bf16.msra.mxu0 %v912_v37 }
 0x2a3   : > { %924 = vmatprep.subr.bf16.mxu0 %v911_v28 }
 0x2a6   : > { %925 = vmatpush1.bf16.msra.mxu0 %v910_v26 }
 0x2a7   : > { %926 = vmatprep.subr.bf16.mxu0 %v909_v38 }
 0x2aa   : > { %927 = vmatpush1.bf16.msra.mxu0 %v908_v43 }
 0x2ab   : > { %928 = vmatprep.subr.bf16.mxu0 %v907_v44 }
 0x2ae   : > { %929 = vmatpush1.bf16.msra.mxu0 %v906_v0 }
 0x2b1   : > { %1091 = vmatmul.mubr.msk.bf16.vlgmr.msra.gmra.mxu0 %vm670_vm1, %v1554_v29 }
 0x2b2   : > { %956 = vmatprep.mubr.bf16.mxu0 %v1255_v6 }
 0x2b9   : > { %1092 = vmatmul.mubr.msk.bf16.gmra.mxu0 %vm670_vm1, %v1565_v27 }
 0x371   : > { %v948_v8 = vpop.f32.mrf.mxu0 }
 0x372   : > { %v949_v47 = vadd.f32 %v948_v8, %v1585_v62 }
 0x373   : > { %v950_v48 = vpop.f32.mrf.mxu0 }
 0x374   : > { %1093 = vst [vmem:[%s1588_s21 + $0x10] sm:$0xff] %v949_v47  ;;  %v951_v49 = vadd.f32 %v950_v48, %v1585_v62 }
 0x375   : > { %v952_v51 = vpop.f32.mrf.mxu0 }
 0x376   : > { %1094 = vst [vmem:[%s1588_s21 + $0x18] sm:$0xff] %v951_v49  ;;  %v953_v52 = vadd.f32 %v952_v51, %v1592_v24 }
 0x377   : > { %v954_v29 = vpop.f32.mrf.mxu0 }
 0x378   : > { %1095 = vst [vmem:[%s1588_s21 + $0x30] sm:$0xff] %v953_v52  ;;  %v955_v6 = vadd.f32 %v954_v29, %v1592_v24 }
 0x379   : > { %v958_v27 = vpop.f32.mrf.mxu0 }
 0x37a   : > { %1096 = vst [vmem:[%s1588_s21 + $0x38] sm:$0xff] %v955_v6  ;;  %v959_v58 = vadd.f32 %v958_v27, %v1598_v40 }
 0x37b   : > { %v960_v57 = vpop.f32.mrf.mxu0 }
 0x37c   : > { %1097 = vst [vmem:[%s1588_s21 + $0x50] sm:$0xff] %v959_v58  ;;  %v961_v62 = vadd.f32 %v960_v57, %v1598_v40 }
 0x37d   : > { %v962_v24 = vpop.f32.mrf.mxu0 }
 0x37e   : > { %1098 = vst [vmem:[%s1588_s21 + $0x58] sm:$0xff] %v961_v62 }
 0x37f   : > { %v963_v59 = vpop.f32.mrf.mxu0 }
 0x380   : > { %1189 = shalt.err (!%p1186_p5)
}
 0x381   : > { %s1190_s19 = scalar_lea.hbm %s1640_s12, 1536  ;;  %s1194_s21 = scalar_lea.hbm %s1701_s7, 3072 }
 0x382   : > { %p1191_p6 = scmp.ne.s32.totalorder %s1640_s12, %s1190_s19  ;;  %p1195_p10 = scmp.lt.s32.totalorder %s1640_s12, %s1701_s7 }
 0x383   : > { %p1196_p11 = scmp.lt.s32.totalorder %s1194_s21, %s1190_s19 }
 0x384   : > { %p1192_p7 = pnand %p1191_p6, %p1339_p4 }
 0x385   : > { %p1197_p12 = por %p1196_p11, %p1195_p10 }
 0x386   : > { %p1193_p9 = pneg %p1192_p7 }
 0x388   : > { %p1198_p13 = pnand %p1197_p12, %p1193_p9 }
 0x38a   : > { %1201 = shalt.err (!%p1198_p13)
}
 0x38b   : > { %s1257_s10 = smov 512   ;;  %s1258_s15 = smov 32  }
 0x38c   : > { %1105 = dma.vmem_to_hbm [thread:$0]  (%p1339_p4), %s1642_s23, 1536, %s1640_s12, %s1649_s27, %s1257_s10, %s1257_s10, %s1258_s15  }
 0x38d PF: > { %p1111_p0 = scmp.ge.s32.totalorder %s1252_s29, 2  ;;  %s1003_s16 = sand.u32 1, %s1232_s24  }
 0x38e   : > { %s1004_s17 = scalar_lea.sflag [#allocation3], %s1003_s16 }
 0x38f   : > { %p1108_p1 = pnand %p1111_p0, %p1346_p8 }
 0x391   : > { %p1109_p2 = pneg %p1108_p1 }
 0x393   : > { %1227 = dma.done.wait (%p1109_p2), %s1004_s17, 1536  }
 0x394   : > { %1229 = vsyncadd (%p1109_p2), %s1004_s17, 4294965760  ;;  %s20_s29 = sadd.s32 1, %s1252_s29   ;;  %s1704_s24 = smov %s1236_s25 }
 0x395   : > { %p17_p3 = scmp.ge.s32.totalorder %s20_s29, 4   ;;  %s1705_s25 = smov %s1240_s26 }
 0x396   : > { %s1706_s26 = smov %s1352_s14  ;;  %s1707_s27 = smov %s1248_s28 }
 0x397   : > { %s1708_s28 = smov %s1710_s9  ;;  %19 = sbr.rel (!%p17_p3) target bundleno = 4 (0x4), region = 85 }
 0x39c   :  { %1009 = vsyncpa [#allocation3], 1 }
 0x39d   :  { %1011 = vsyncpa [#allocation3 + $0x1], 1 }

</bundles_post_ra>
